<compile_context>
chip_gen: v5e
topology: v5e:2x2
jax: 0.10.0
libtpu: 0.0.40
codegen_flags: <defaults>
</compile_context>

<pallas_src>
import math

import jax
import jax.numpy as jnp
from jax.experimental import pallas as pl
from jax.experimental.pallas import tpu as pltpu


_MAX_LANE = 8192   # cap on lane-packed / lane-tile width (multiple of 128)


def _tpu_config():
    """(target x-block bytes, #TensorCores sharing the grid) for the local chip."""
    block_bytes = 2 * 1024 * 1024     # v5e default: 820 GB/s HBM -> 2 MiB already past the knee
    cores = 1
    try:
        kind = (jax.devices()[0].device_kind or "").lower()
    except Exception:
        kind = ""
    if "v7" in kind:
        # 3.2 TB/s HBM: a 2 MiB step is only ~1.25 us, so the ~0.35 us/step pipeline
        # overhead would be 20-25%; bigger blocks drop it under ~10%.  2 TCs/chip.
        block_bytes = 6 * 1024 * 1024
        cores = 2
    elif "v6" in kind:
        block_bytes = 4 * 1024 * 1024
    return block_bytes, cores


def _affine_kernel(ab_ref, x_ref, o_ref):
    # ab_ref: (2, tn) f32 (row 0 = alpha, row 1 = beta); x_ref/o_ref: (tm, tn) tiles.
    # Sublane broadcast happens in-register on the VPU; the FMA rides for free under
    # the DMA stalls (kernel is HBM-bandwidth bound).  Compute in f32, cast on store.
    ab = ab_ref[...]
    a = ab[0:1, :]
    b = ab[1:2, :]
    x = x_ref[...].astype(jnp.float32)
    o_ref[...] = (a * x + b).astype(o_ref.dtype)


def _pick_packed_lane(dim, total):
    """Largest L <= _MAX_LANE with L % 128 == 0, L % dim == 0 and total % L == 0."""
    base = (dim * 128) // math.gcd(dim, 128)   # lcm(dim, 128)
    if base > _MAX_LANE:
        return None
    best = None
    k = 1
    while k * base <= _MAX_LANE:
        L = k * base
        if total % L == 0:
            best = L
        k += 1
    return best


def _choose_tm(rows, lane, itemsize, block_bytes, cores):
    """Row tile: multiple of 8 (or full extent), ~block_bytes, >= `cores` row blocks."""
    if rows <= 8:
        return rows                                   # full extent -> exempt from 8-divisibility
    tm = block_bytes // max(1, lane * itemsize)
    tm = max(8, (tm // 8) * 8)
    tm = min(tm, (rows // 8) * 8)                     # stay <= rows, keep multiple of 8
    if cores >= 2:
        # Guarantee >= `cores` blocks along the parallel row axis so every TensorCore
        # gets work (prioritized over block-size growth for mid-size tensors).
        cap = max(8, ((-(-rows // cores) + 7) // 8) * 8)
        tm = min(tm, cap)
    return max(8, tm)


def affine(x, alpha, beta, *, donate_x=False):
    """y = alpha * x + beta, broadcasting alpha/beta (shape (dim,)) over x (..., dim)."""
    orig_shape = x.shape
    dim = orig_shape[-1]
    assert alpha.shape == (dim,) and beta.shape == (dim,)

    alpha_f32 = alpha.astype(jnp.float32)
    beta_f32 = beta.astype(jnp.float32)

    if not jnp.issubdtype(x.dtype, jnp.floating):
        # TODO(synk): integer inputs promote to f32 like PyTorch; kernel path would truncate.
        return alpha_f32 * x + beta_f32
    if x.size == 0:
        return x

    total = x.size
    itemsize = jnp.dtype(x.dtype).itemsize
    block_bytes, cores = _tpu_config()

    # ---- choose layout -------------------------------------------------------------
    packed_lane = None
    if dim < 128 or dim % 128 != 0:
        packed_lane = _pick_packed_lane(dim, total)

    if packed_lane is not None:
        # Lane-dense path: flatten all elements into rows of width L (multiple of 128).
        # Element j of any such row has feature index j % dim, so tiling alpha/beta
        # L//dim times reproduces the broadcast exactly; all stores are unmasked vst.
        L = packed_lane
        x2 = x.reshape(-1, L)
        reps = L // dim
        a_row = jnp.tile(alpha_f32, reps)
        b_row = jnp.tile(beta_f32, reps)
        tn = L
    else:
        # Channels-last path: rows on the sublane axis, features on the lane axis.
        x2 = x.reshape(-1, dim)
        a_row = alpha_f32
        b_row = beta_f32
        if dim % 128 == 0:
            tn = min(dim, _MAX_LANE)      # full contiguous rows (or 128-aligned chunks)
        elif dim > _MAX_LANE:
            tn = _MAX_LANE                # 128-aligned tile; only last lane block masked
        else:
            tn = dim                      # full-extent exemption (contiguous row DMAs)
        # TODO(synk): when total % lcm(dim,128) != 0 this keeps dim on the lane axis
        # (masked stores); a copy-free packed-main + tiny-tail split needs output donation.

    ab = jnp.stack([a_row, b_row])        # (2, lane_total) f32; tiny, folds under jit

    m, lane_total = x2.shape
    tm = _choose_tm(m, tn, itemsize, block_bytes, cores)

    grid = (pl.cdiv(m, tm), pl.cdiv(lane_total, tn))

    # Scoped-VMEM claim sized from the real double-buffered working set (+ ~25% headroom),
    # instead of a blanket 32 MiB (v7x has only 64 MiB VMEM per TensorCore).
    ws = 2 * (2 * tm * tn * itemsize + 2 * tn * 4)
    vmem_limit = int(min(max(ws + ws // 4 + (2 << 20), 16 << 20), 40 << 20))

    out = pl.pallas_call(
        _affine_kernel,
        out_shape=jax.ShapeDtypeStruct((m, lane_total), x.dtype),
        grid_spec=pltpu.PrefetchScalarGridSpec(
            num_scalar_prefetch=0,
            grid=grid,
            in_specs=[
                pl.BlockSpec((2, tn), lambda i, j: (0, j)),    # fused alpha/beta rows
                pl.BlockSpec((tm, tn), lambda i, j: (i, j)),   # x tile
            ],
            out_specs=pl.BlockSpec((tm, tn), lambda i, j: (i, j)),
        ),
        compiler_params=pltpu.CompilerParams(
            dimension_semantics=("parallel", "parallel"),
            vmem_limit_bytes=vmem_limit,
        ),
        input_output_aliases=({1: 0} if donate_x else {}),
    )(ab, x2)

    return out.reshape(orig_shape)


if __name__ == "__main__":
    key = jax.random.PRNGKey(0)

    # --- test 1: the module's natural shape (lane-packed path, dim=32 < 128) ---------
    batch, seq, dim = 2, 8, 32
    alpha = jnp.ones((dim,), jnp.float32) + 0.1 * jax.random.normal(key, (dim,), jnp.float32)
    beta = jnp.zeros((dim,), jnp.float32) + 0.05 * jnp.arange(dim, dtype=jnp.float32)
    kx = jax.random.fold_in(key, 1)
    x = jax.random.normal(kx, (batch, seq, dim), jnp.float32)

    y = jax.block_until_ready(affine(x, alpha, beta))
    y_ref = alpha * x + beta
    assert y.shape == x.shape and y.dtype == x.dtype
    assert jnp.allclose(y, y_ref, atol=1e-6, rtol=1e-6)

    # --- test 2: non-128-aligned dim + ragged row tiles (fallback path) --------------
    dim2 = 200
    k2 = jax.random.fold_in(key, 2)
    alpha2 = jnp.ones((dim2,), jnp.float32) + 0.1 * jax.random.normal(k2, (dim2,), jnp.float32)
    beta2 = 0.01 * jnp.arange(dim2, dtype=jnp.float32)
    x2 = jax.random.normal(jax.random.fold_in(key, 3), (3, 5, dim2), jnp.float32)

    y2 = jax.block_until_ready(affine(x2, alpha2, beta2))
    y2_ref = alpha2 * x2 + beta2
    assert y2.shape == x2.shape and y2.dtype == x2.dtype
    assert jnp.allclose(y2, y2_ref, atol=1e-6, rtol=1e-6)

    # --- test 3: 128-aligned dim (channels-last contiguous-row path) -----------------
    dim3 = 256
    k3 = jax.random.fold_in(key, 4)
    alpha3 = jnp.ones((dim3,), jnp.float32) + 0.1 * jax.random.normal(k3, (dim3,), jnp.float32)
    beta3 = 0.02 * jnp.arange(dim3, dtype=jnp.float32)
    x3 = jax.random.normal(jax.random.fold_in(key, 5), (4, 3, dim3), jnp.float32)

    y3 = jax.block_until_ready(affine(x3, alpha3, beta3))
    y3_ref = alpha3 * x3 + beta3
    assert y3.shape == x3.shape and y3.dtype == x3.dtype
    assert jnp.allclose(y3, y3_ref, atol=1e-6, rtol=1e-6)

    print("KERNEL_OK")
</pallas_src>

<mosaic_0001>
module attributes {stable_mosaic.version = 11 : i64} {
  func.func @_affine_kernel(%arg0: i32, %arg1: i32, %arg2: memref<2x512xf32, #tpu.memory_space<vmem>>, %arg3: memref<1x512xf32, #tpu.memory_space<vmem>>, %arg4: memref<1x512xf32, #tpu.memory_space<vmem>>) attributes {dimension_semantics = [#tpu.dimension_semantics<parallel>, #tpu.dimension_semantics<parallel>], iteration_bounds = array<i64: 1, 1>, scalar_prefetch = 0 : i64, scratch_operands = 0 : i64, tpu.core_type = #tpu.core_type<tc>, window_params = [{transform_indices = @transform_0, window_bounds = array<i64: 2, 512>}, {transform_indices = @transform_1, window_bounds = array<i64: 1, 512>}, {transform_indices = @transform_2, window_bounds = array<i64: 1, 512>}]} {
    %c0 = arith.constant 0 : index
    %c0_0 = arith.constant 0 : index
    %0 = vector.load %arg2[%c0, %c0_0] : memref<2x512xf32, #tpu.memory_space<vmem>>, vector<2x512xf32>
    %1 = vector.extract_strided_slice %0 {offsets = [0, 0], sizes = [1, 512], strides = [1, 1]} : vector<2x512xf32> to vector<1x512xf32>
    %2 = vector.extract_strided_slice %0 {offsets = [1, 0], sizes = [1, 512], strides = [1, 1]} : vector<2x512xf32> to vector<1x512xf32>
    %c0_1 = arith.constant 0 : index
    %c0_2 = arith.constant 0 : index
    %3 = vector.load %arg3[%c0_1, %c0_2] : memref<1x512xf32, #tpu.memory_space<vmem>>, vector<1x512xf32>
    %4 = arith.mulf %1, %3 : vector<1x512xf32>
    %5 = arith.addf %4, %2 : vector<1x512xf32>
    %c0_3 = arith.constant 0 : index
    %c0_4 = arith.constant 0 : index
    %6 = vector.load %arg4[%c0_3, %c0_4] : memref<1x512xf32, #tpu.memory_space<vmem>>, vector<1x512xf32>
    tpu.vector_store %arg4[%c0_3, %c0_4], %5 {strides = array<i32>} : memref<1x512xf32, #tpu.memory_space<vmem>>, vector<1x512xf32>,
    return
  }
  func.func @transform_0(%arg0: i32, %arg1: i32) -> (i32, i32) {
    %c0_i32 = arith.constant 0 : i32
    %c0_i32_0 = arith.constant 0 : i32
    return %c0_i32, %arg1 : i32, i32
  }
  func.func @transform_1(%arg0: i32, %arg1: i32) -> (i32, i32) {
    %c0_i32 = arith.constant 0 : i32
    return %arg0, %arg1 : i32, i32
  }
  func.func @transform_2(%arg0: i32, %arg1: i32) -> (i32, i32) {
    %c0_i32 = arith.constant 0 : i32
    return %arg0, %arg1 : i32, i32
  }
}

</mosaic_0001>

<bundles_post_ra>
// kernel: tpu_custom_call.1
= control target key start
LH: loop header
LB: loop body
LE: loop exit
PB: predicated region body
PF: predicated region fallthrough
CT: control target
= control target key end

     0   :  { %7 = vsyncpa [#allocation3], 0  ;;  %s199_s0 = inlined_call_operand.hbm [shape: f32[2,512], index: 0, kind: input, shape index: {}]   ;;  %s200_s1 = inlined_call_operand.hbm [shape: f32[1,512], index: 1, kind: input, shape index: {}]   ;;  %s201_s2 = inlined_call_operand.hbm [shape: f32[1,512], index: 2, kind: output, shape index: {}]  }
   0x1   :  { %8 = vsyncpa [#allocation6], 0 }
   0x2   :  { %9 = vsyncpa [#allocation4], 0  ;;  %s15_s11 = sshll.u32 %s199_s0, 4  ;;  %s171_s12 = smov [#allocation2]   ;;  %s16_s11 = int_to_ptr.hbm [resolvable:$true] %s15_s11 }
   0x3   :  { %s17_s13 = sshll.u32 %s171_s12, 4  ;;  %s26_s16 = sshll.u32 %s200_s1, 4  ;;  %s18_s13 = int_to_ptr.vmem [resolvable:$true] %s17_s13  ;;  %s27_s16 = int_to_ptr.hbm [resolvable:$true] %s26_s16 }
   0x4   :  { %20 = dma.hbm_to_vmem [thread:$0]  %s16_s11, 128, %s18_s13, [#allocation3]  }
   0x5   :  { %s172_s17 = smov [#allocation5]  }
   0x6   :  { %s28_s18 = sshll.u32 %s172_s17, 4  ;;  %s29_s18 = int_to_ptr.vmem [resolvable:$true] %s28_s18 }
   0x7   :  { %31 = dma.hbm_to_vmem [thread:$0]  %s27_s16, 64, %s29_s18, [#allocation6]  }
   0x8   :  { %165 = dma.done.wait [#allocation3], 128  }
   0x9   :  { %166 = vsyncadd [#allocation3], 4294967168 }
   0xa   :  { %167 = dma.done.wait [#allocation6], 64  }
   0xb   :  { %168 = vsyncadd [#allocation6], 4294967232  ;;  %v173_v0 = vmov 857870592   ;;  %v40_v3 = vld [vmem:[#allocation2] sm:$0xff]  ;;  %v65_v8 = vlaneseq  ;;  %vm58_vm0 = vcmask 1040384  }
   0xc   :  { %v44_v1 = vunpack.c.l.s4 %v173_v0  ;;  %v41_v4 = vld [vmem:[#allocation5] sm:$0xf]  ;;  %v88_v6 = vrot.slane %v40_v3, 9  ;;  %vm60_vm1 = vcmask 1042434   ;;  %s174_s0 = smov [#allocation7]   ;;  %s77_s21 = sshll.u32 %s201_s2, 4  ;;  %s78_s21 = int_to_ptr.hbm [resolvable:$true] %s77_s21 }
   0xd   :  { %s75_s1 = sshll.u32 %s174_s0, 4  ;;  %vm62_vm2 = vcmask 1041408   ;;  %vm67_vm3 = vcmp.lt.s32.totalorder %v65_v8, 512  ;;  %s76_s1 = int_to_ptr.vmem [resolvable:$true] %s75_s1 }
   0xe   :  { %v45_v2 = vunpack.c.0.s8 %v44_v1 }
  0x10   :  { %v46_v5 = vperm.slane %v41_v4, %v45_v2 }
  0x12   :  { %v48_v7 = vmul.f32 %v46_v5, %v40_v3 }
  0x14   :  { %v53_v9 = vadd.f32 %v88_v6, %v48_v7 }
  0x16   :  { %v55_v10 = vrot.slane %v53_v9, 1  ;;  %v56_v11 = vrot.slane %v53_v9, 2  ;;  %v57_v12 = vrot.slane %v53_v9, 3 }
  0x18   :  { %v59_v13 = vsel %vm58_vm0, %v53_v9, %v55_v10  ;;  %v61_v14 = vsel %vm60_vm1, %v56_v11, %v57_v12 }
  0x19   :  { %v63_v15 = vsel %vm62_vm2, %v59_v13, %v61_v14 }
  0x1a   :  { %69 = vst.msk [vmem:[#allocation7] sm:$0xf] %vm67_vm3, %v63_v15 }
  0x1b   :  { %80 = dma.vmem_to_hbm [thread:$0]  %s76_s1, 64, %s78_s21, [#allocation4]  }
  0x1c   :  { %169 = dma.done.wait [#allocation4], 64  }
  0x1d   :  { %170 = vsyncadd [#allocation4], 4294967232 }
  0x1e   :  { %85 = vsyncpa [#allocation3], 1 }
  0x1f   :  { %86 = vsyncpa [#allocation6], 1 }
  0x20   :  { %87 = vsyncpa [#allocation4], 1 }

</bundles_post_ra>
